<compile_context>
chip_gen: v5e
topology: v5e:2x2
jax: 0.10.0
libtpu: 0.0.40
codegen_flags: <defaults>
</compile_context>

<pallas_src>
import functools
import math

import jax
import jax.numpy as jnp
from jax.experimental import pallas as pl
from jax.experimental.pallas import tpu as pltpu


# -----------------------------------------------------------------------------
# Kernel 1: ConvChannelEmbeding = depthwise patch conv + BatchNorm2d(train) + ReLU6
# -----------------------------------------------------------------------------
def _ce_kernel(p_ref, w_ref, gamma_ref, beta_ref, o_ref, *, cb, kk, eps):
    """Grid axis 0 = channel block.

    p_ref : (Cb, K, N, S) VMEM  lane-dense patches (S = Ho*Wo on lanes)
    w_ref : (C*K,)        SMEM  flat depthwise taps, read as scalars
    gamma_ref, beta_ref : (C,)  SMEM
    o_ref : (N, Cb, S)    VMEM  written straight into the (N, C, S) output
    """
    cblk = pl.program_id(0)
    n, _, s = o_ref.shape
    inv_count = 1.0 / float(n * s)

    for ci in range(cb):
        ch = cblk * cb + ci
        # depthwise conv: K scalar-broadcast FMAs over lane-dense (N, S) tiles (pure VPU).
        conv = w_ref[ch * kk] * p_ref[ci, 0]
        for k in range(1, kk):
            conv = conv + w_ref[ch * kk + k] * p_ref[ci, k]
        # conv bias intentionally omitted: training-mode BN subtracts the per-channel mean,
        # which cancels any per-channel additive bias exactly.

        # single-pass batch-norm statistics (biased, training mode)
        mean = jnp.sum(conv) * inv_count
        ex2 = jnp.sum(conv * conv) * inv_count
        var = ex2 - mean * mean
        scale = jax.lax.rsqrt(var + eps) * gamma_ref[ch]
        shift = beta_ref[ch] - mean * scale

        y = conv * scale + shift
        o_ref[:, ci, :] = jnp.clip(y, 0.0, 6.0).astype(o_ref.dtype)


def conv_channel_embedding(x, w, gamma, beta, down_ratio, eps=1e-5):
    """x: (N, C, H, W) f32, w: (C, 1, d, d), gamma/beta: (C,)  ->  (N, C, S=Ho*Wo)."""
    N, C, H, W = x.shape
    d = down_ratio
    Ho, Wo = H // d, W // d
    S, K = Ho * Wo, d * d

    # Lane-dense patch layout.  This is the single remaining fused XLA transpose on the
    # input side; the output side is produced directly in (N, C, S) (no transpose after).
    p = x.reshape(N, C, Ho, d, Wo, d)
    p = jnp.transpose(p, (1, 3, 5, 0, 2, 4)).reshape(C, K, N, S)

    wf = w.reshape(C * K)  # flat 1-D taps -> SMEM scalars (avoids 2-D SMEM padding blow-up)

    # Channel block size: the output block's sublane dim is Cb, so Cb must be a multiple
    # of 8 or the full channel count (for the tiny demo C=4 -> one block).
    cb = 8 if (C % 8 == 0) else C
    grid = (C // cb,)

    kernel = functools.partial(_ce_kernel, cb=cb, kk=K, eps=eps)
    return pl.pallas_call(
        kernel,
        out_shape=jax.ShapeDtypeStruct((N, C, S), x.dtype),
        grid=grid,
        in_specs=[
            pl.BlockSpec((cb, K, N, S), lambda c: (c, 0, 0, 0)),
            pl.BlockSpec(memory_space=pltpu.MemorySpace.SMEM),   # flat conv taps
            pl.BlockSpec(memory_space=pltpu.MemorySpace.SMEM),   # BN gamma
            pl.BlockSpec(memory_space=pltpu.MemorySpace.SMEM),   # BN beta
        ],
        out_specs=pl.BlockSpec((N, cb, S), lambda c: (0, c, 0)),
        compiler_params=pltpu.CompilerParams(dimension_semantics=("parallel",)),
    )(p, wf, gamma, beta)


# -----------------------------------------------------------------------------
# Kernel 2: one PyTorch TransformerEncoderLayer (post-norm, ReLU, dropout = identity)
# -----------------------------------------------------------------------------
def _encoder_layer_kernel(x_ref, w_in_ref, b_in_ref, w_out_ref, b_out_ref,
                          ln1_w_ref, ln1_b_ref, ln2_w_ref, ln2_b_ref,
                          w1_ref, b1_ref, w2_ref, b2_ref, o_ref, *, heads, eps):
    """One 'batch' element per grid step.  With batch_first=False the sequence axis is the
    image-batch axis N and the batch axis is the channel axis C (grid runs over C)."""
    x = x_ref[...]                     # (N, E)
    n, e = x.shape
    dh = e // heads
    scale = 1.0 / math.sqrt(dh)

    qkv = jnp.dot(x, w_in_ref[...], preferred_element_type=jnp.float32) + b_in_ref[...]
    q = qkv[:, :e] * scale
    k = qkv[:, e:2 * e]
    v = qkv[:, 2 * e:]

    attn = jnp.zeros((n, e), jnp.float32)
    for h in range(heads):
        lo, hi = h * dh, (h + 1) * dh
        qh, kh, vh = q[:, lo:hi], k[:, lo:hi], v[:, lo:hi]
        s = jax.lax.dot_general(qh, kh, (((1,), (1,)), ((), ())),
                                preferred_element_type=jnp.float32)      # (N, N)
        s = s - jnp.max(s, axis=-1, keepdims=True)
        pexp = jnp.exp(s)
        probs = pexp / jnp.sum(pexp, axis=-1, keepdims=True)
        oh = jnp.dot(probs, vh, preferred_element_type=jnp.float32)      # (N, Dh)
        attn = attn + jnp.dot(oh, w_out_ref[lo:hi, :],
                              preferred_element_type=jnp.float32)        # (N, E)
    attn = attn + b_out_ref[...]

    def layer_norm(t, w_r, b_r):
        mu = jnp.mean(t, axis=-1, keepdims=True)
        var = jnp.mean((t - mu) ** 2, axis=-1, keepdims=True)
        return (t - mu) * jax.lax.rsqrt(var + eps) * w_r[...] + b_r[...]

    y = layer_norm(x + attn, ln1_w_ref, ln1_b_ref)                       # post-norm 1
    hid = jnp.maximum(
        jnp.dot(y, w1_ref[...], preferred_element_type=jnp.float32) + b1_ref[...], 0.0)
    ffn = jnp.dot(hid, w2_ref[...], preferred_element_type=jnp.float32) + b2_ref[...]
    o_ref[...] = layer_norm(y + ffn, ln2_w_ref, ln2_b_ref).astype(o_ref.dtype)


def transformer_encoder_layer(z, p, heads, eps=1e-5):
    """z: (C, N, E)  (batch = C on the grid, sequence = N, embed = E = Ho*Wo)."""
    C, N, E = z.shape
    F = p["l1_w"].shape[0]
    assert E % heads == 0

    def full(shape):
        return pl.BlockSpec(shape, lambda c, r=len(shape): (0,) * r)

    kernel = functools.partial(_encoder_layer_kernel, heads=heads, eps=eps)
    return pl.pallas_call(
        kernel,
        out_shape=jax.ShapeDtypeStruct((C, N, E), z.dtype),
        grid=(C,),
        in_specs=[
            pl.BlockSpec((None, N, E), lambda c: (c, 0, 0)),   # x: one channel per step
            full((E, 3 * E)), full((1, 3 * E)),                # in_proj  (pre-transposed)
            full((E, E)), full((1, E)),                        # out_proj (pre-transposed)
            full((1, E)), full((1, E)),                        # layer-norm 1
            full((1, E)), full((1, E)),                        # layer-norm 2
            full((E, F)), full((1, F)),                        # linear1  (pre-transposed)
            full((F, E)), full((1, E)),                        # linear2  (pre-transposed)
        ],
        out_specs=pl.BlockSpec((None, N, E), lambda c: (c, 0, 0)),
        compiler_params=pltpu.CompilerParams(dimension_semantics=("parallel",)),
    )(z,
      p["in_w"].T, p["in_b"].reshape(1, 3 * E),
      p["out_w"].T, p["out_b"].reshape(1, E),
      p["ln1_w"].reshape(1, E), p["ln1_b"].reshape(1, E),
      p["ln2_w"].reshape(1, E), p["ln2_b"].reshape(1, E),
      p["l1_w"].T, p["l1_b"].reshape(1, F),
      p["l2_w"].T, p["l2_b"].reshape(1, E))


# -----------------------------------------------------------------------------
# Kernel 3: residual add + UpsamplingBilinear2d(scale_factor=d), align_corners=True
# -----------------------------------------------------------------------------
def _bilinear_matrix(n_in, n_out):
    """(n_out, n_in) interpolation matrix for align_corners=True bilinear resizing."""
    pos = jnp.arange(n_out, dtype=jnp.float32) * (float(n_in - 1) / float(n_out - 1))
    i0 = jnp.clip(jnp.floor(pos), 0.0, float(n_in - 2)).astype(jnp.int32)
    t = pos - i0.astype(jnp.float32)
    rows = jnp.arange(n_out)
    m = jnp.zeros((n_out, n_in), jnp.float32)
    m = m.at[rows, i0].add(1.0 - t)
    m = m.at[rows, i0 + 1].add(t)
    return m


def _upsample_kernel(y_ref, s_ref, ah_ref, awt_ref, o_ref):
    z = y_ref[...] + s_ref[...]                                        # residual, (Ho, Wo)
    t = jnp.dot(ah_ref[...], z, preferred_element_type=jnp.float32)   # (H, Wo)
    o_ref[...] = jnp.dot(t, awt_ref[...],
                         preferred_element_type=jnp.float32).astype(o_ref.dtype)


def upsample_add(y, shortcut, d):
    N, C, Ho, Wo = y.shape
    H, W = Ho * d, Wo * d
    ah = _bilinear_matrix(Ho, H)          # (H, Ho)
    awt = _bilinear_matrix(Wo, W).T       # (Wo, W)
    return pl.pallas_call(
        _upsample_kernel,
        out_shape=jax.ShapeDtypeStruct((N, C, H, W), y.dtype),
        grid=(N, C),
        in_specs=[
            pl.BlockSpec((None, None, Ho, Wo), lambda n, c: (n, c, 0, 0)),
            pl.BlockSpec((None, None, Ho, Wo), lambda n, c: (n, c, 0, 0)),
            pl.BlockSpec((H, Ho), lambda n, c: (0, 0)),
            pl.BlockSpec((Wo, W), lambda n, c: (0, 0)),
        ],
        out_specs=pl.BlockSpec((None, None, H, W), lambda n, c: (n, c, 0, 0)),
        compiler_params=pltpu.CompilerParams(
            dimension_semantics=("parallel", "parallel")),
    )(y, shortcut, ah, awt)


# -----------------------------------------------------------------------------
# Full ChannelAttnBlock forward
# -----------------------------------------------------------------------------
def channel_attn_block_forward(x, params, down_ratio, heads):
    N, C, H, W = x.shape
    d = down_ratio
    Ho, Wo = H // d, W // d
    S = Ho * Wo

    # 1) ConvChannelEmbeding (fused conv + BN + ReLU6), output already (N, C, S)
    ce = conv_channel_embedding(x, params["ce_w"], params["ce_gamma"],
                                params["ce_beta"], d)
    shortcut = ce.reshape(N, C, Ho, Wo)

    # 2) positional embedding (+ pos_drop)
    # TODO(synk): train-mode dropout (p=0.1) needs an RNG; implemented as identity (eval).
    seq = ce + params["pos_embed"]                       # (N, C, S)

    # 3) 4x TransformerEncoderLayer.  PyTorch default batch_first=False => layers see
    #    (seq = N, batch = C, embed = S); the kernel batches over C on its grid.
    z = jnp.transpose(seq, (1, 0, 2))                    # (C, N, S), tiny
    for lp in params["layers"]:
        z = transformer_encoder_layer(z, lp, heads)
    attn_out = jnp.transpose(z, (1, 0, 2)).reshape(N, C, Ho, Wo)

    # 4) residual + bilinear upsample (align_corners=True), fused kernel
    return upsample_add(attn_out, shortcut, d)


# -----------------------------------------------------------------------------
# Pure-JAX reference (for self-check)
# -----------------------------------------------------------------------------
def _ref_encoder_layer(x, p, heads, eps=1e-5):
    Sq, B, E = x.shape
    Dh = E // heads
    hp = dict(precision="highest")
    qkv = jnp.einsum('sbe,fe->sbf', x, p["in_w"], **hp) + p["in_b"]
    q, k, v = qkv[..., :E], qkv[..., E:2 * E], qkv[..., 2 * E:]
    q = q.reshape(Sq, B, heads, Dh)
    k = k.reshape(Sq, B, heads, Dh)
    v = v.reshape(Sq, B, heads, Dh)
    scores = jnp.einsum('sbhd,tbhd->bhst', q, k, **hp) / math.sqrt(Dh)
    probs = jax.nn.softmax(scores, axis=-1)
    o = jnp.einsum('bhst,tbhd->sbhd', probs, v, **hp).reshape(Sq, B, E)
    attn = jnp.einsum('sbe,fe->sbf', o, p["out_w"], **hp) + p["out_b"]

    def ln(t, w, b):
        mu = t.mean(axis=-1, keepdims=True)
        var = ((t - mu) ** 2).mean(axis=-1, keepdims=True)
        return (t - mu) * jax.lax.rsqrt(var + eps) * w + b

    y = ln(x + attn, p["ln1_w"], p["ln1_b"])
    hid = jnp.maximum(jnp.einsum('sbe,fe->sbf', y, p["l1_w"], **hp) + p["l1_b"], 0.0)
    f = jnp.einsum('sbf,ef->sbe', hid, p["l2_w"], **hp) + p["l2_b"]
    return ln(y + f, p["ln2_w"], p["ln2_b"])


def _reference_forward(x, params, d, heads, eps_bn=1e-5):
    N, C, H, W = x.shape
    Ho, Wo = H // d, W // d
    S = Ho * Wo

    conv = jax.lax.conv_general_dilated(
        x, params["ce_w"], (d, d), "VALID", feature_group_count=C,
        dimension_numbers=("NCHW", "OIHW", "NCHW"), precision="highest")
    conv = conv + params["ce_b"][None, :, None, None]   # cancelled by training-mode BN
    mean = conv.mean(axis=(0, 2, 3), keepdims=True)
    var = ((conv - mean) ** 2).mean(axis=(0, 2, 3), keepdims=True)
    ce = (conv - mean) * jax.lax.rsqrt(var + eps_bn)
    ce = ce * params["ce_gamma"][None, :, None, None] + params["ce_beta"][None, :, None, None]
    ce = jnp.clip(ce, 0.0, 6.0)

    shortcut = ce
    z = ce.reshape(N, C, S) + params["pos_embed"]
    for lp in params["layers"]:
        z = _ref_encoder_layer(z, lp, heads)
    y = z.reshape(N, C, Ho, Wo) + shortcut

    ah = _bilinear_matrix(Ho, H)
    aw = _bilinear_matrix(Wo, W)
    return jnp.einsum('ip,ncpq,jq->ncij', ah, y, aw, precision="highest")


if __name__ == "__main__":
    N, C, H, W = 2, 4, 16, 16
    down_ratio, heads = 2, 4
    Ho, Wo = H // down_ratio, W // down_ratio
    dim = Ho * Wo          # 64 == self.dim in the module
    ffn = dim * 4

    key = jax.random.PRNGKey(0)
    keys = jax.random.split(key, 7)
    x = jax.random.normal(keys[0], (N, C, H, W), dtype=jnp.float32)

    params = {
        "ce_w": 0.5 * jax.random.normal(keys[1], (C, 1, down_ratio, down_ratio), jnp.float32),
        "ce_b": 0.1 * jax.random.normal(keys[2], (C,), jnp.float32),   # reference only
        "ce_gamma": 1.0 + 0.1 * jax.random.normal(keys[3], (C,), jnp.float32),
        "ce_beta": 0.1 * jax.random.normal(keys[4], (C,), jnp.float32),
        "pos_embed": 0.02 * jax.random.normal(keys[5], (1, C, dim), jnp.float32),
        "layers": [],
    }
    for lkey in jax.random.split(keys[6], 4):
        k = jax.random.split(lkey, 12)
        params["layers"].append({
            "in_w": 0.05 * jax.random.normal(k[0], (3 * dim, dim), jnp.float32),
            "in_b": 0.02 * jax.random.normal(k[1], (3 * dim,), jnp.float32),
            "out_w": 0.05 * jax.random.normal(k[2], (dim, dim), jnp.float32),
            "out_b": 0.02 * jax.random.normal(k[3], (dim,), jnp.float32),
            "ln1_w": 1.0 + 0.05 * jax.random.normal(k[4], (dim,), jnp.float32),
            "ln1_b": 0.02 * jax.random.normal(k[5], (dim,), jnp.float32),
            "ln2_w": 1.0 + 0.05 * jax.random.normal(k[6], (dim,), jnp.float32),
            "ln2_b": 0.02 * jax.random.normal(k[7], (dim,), jnp.float32),
            "l1_w": 0.05 * jax.random.normal(k[8], (ffn, dim), jnp.float32),
            "l1_b": 0.02 * jax.random.normal(k[9], (ffn,), jnp.float32),
            "l2_w": 0.05 * jax.random.normal(k[10], (dim, ffn), jnp.float32),
            "l2_b": 0.02 * jax.random.normal(k[11], (dim,), jnp.float32),
        })

    out = channel_attn_block_forward(x, params, down_ratio, heads)
    out = jax.block_until_ready(out)

    ref = _reference_forward(x, params, down_ratio, heads)
    assert out.shape == (N, C, H, W), out.shape
    rel_err = float(jnp.linalg.norm(out - ref) / jnp.linalg.norm(ref))
    assert rel_err < 3e-2, f"mismatch vs reference, rel_err={rel_err}"

    print("KERNEL_OK")
</pallas_src>

<mosaic_0001>
module attributes {stable_mosaic.version = 11 : i64} {
  func.func @_ce_kernel(%arg0: i32, %arg1: memref<4x4x2x64xf32, #tpu.memory_space<vmem>>, %arg2: memref<16xf32, #tpu.memory_space<smem>>, %arg3: memref<4xf32, #tpu.memory_space<smem>>, %arg4: memref<4xf32, #tpu.memory_space<smem>>, %arg5: memref<2x4x64xf32, #tpu.memory_space<vmem>>) attributes {dimension_semantics = [#tpu.dimension_semantics<parallel>], iteration_bounds = array<i64: 1>, scalar_prefetch = 0 : i64, scratch_operands = 0 : i64, tpu.core_type = #tpu.core_type<tc>, window_params = [{transform_indices = @transform_0, window_bounds = array<i64: 4, 4, 2, 64>}, {transform_indices = @transform_1, window_bounds = array<i64: 16>}, {transform_indices = @transform_2, window_bounds = array<i64: 4>}, {transform_indices = @transform_3, window_bounds = array<i64: 4>}, {transform_indices = @transform_4, window_bounds = array<i64: 2, 4, 64>}]} {
    %c4_i32 = arith.constant 4 : i32
    %0 = arith.muli %arg0, %c4_i32 : i32
    %c0_i32 = arith.constant 0 : i32
    %1 = arith.addi %0, %c0_i32 : i32
    %c4_i32_0 = arith.constant 4 : i32
    %2 = arith.muli %1, %c4_i32_0 : i32
    %3 = arith.index_cast %2 : i32 to index
    %4 = memref.load %arg2[%3] : memref<16xf32, #tpu.memory_space<smem>>
    %c0 = arith.constant 0 : index
    %c0_1 = arith.constant 0 : index
    %c0_2 = arith.constant 0 : index
    %c0_3 = arith.constant 0 : index
    %5 = vector.load %arg1[%c0, %c0_1, %c0_2, %c0_3] : memref<4x4x2x64xf32, #tpu.memory_space<vmem>>, vector<1x1x2x64xf32>
    %6 = vector.shape_cast %5 : vector<1x1x2x64xf32> to vector<2x64xf32>
    %7 = vector.broadcast %4 : f32 to vector<2x64xf32>
    %8 = arith.mulf %7, %6 : vector<2x64xf32>
    %c4_i32_4 = arith.constant 4 : i32
    %9 = arith.muli %1, %c4_i32_4 : i32
    %c1_i32 = arith.constant 1 : i32
    %10 = arith.addi %9, %c1_i32 : i32
    %11 = arith.index_cast %10 : i32 to index
    %12 = memref.load %arg2[%11] : memref<16xf32, #tpu.memory_space<smem>>
    %c0_5 = arith.constant 0 : index
    %c1 = arith.constant 1 : index
    %c0_6 = arith.constant 0 : index
    %c0_7 = arith.constant 0 : index
    %13 = vector.load %arg1[%c0_5, %c1, %c0_6, %c0_7] : memref<4x4x2x64xf32, #tpu.memory_space<vmem>>, vector<1x1x2x64xf32>
    %14 = vector.shape_cast %13 : vector<1x1x2x64xf32> to vector<2x64xf32>
    %15 = vector.broadcast %12 : f32 to vector<2x64xf32>
    %16 = arith.mulf %15, %14 : vector<2x64xf32>
    %17 = arith.addf %8, %16 : vector<2x64xf32>
    %c4_i32_8 = arith.constant 4 : i32
    %18 = arith.muli %1, %c4_i32_8 : i32
    %c2_i32 = arith.constant 2 : i32
    %19 = arith.addi %18, %c2_i32 : i32
    %20 = arith.index_cast %19 : i32 to index
    %21 = memref.load %arg2[%20] : memref<16xf32, #tpu.memory_space<smem>>
    %c0_9 = arith.constant 0 : index
    %c2 = arith.constant 2 : index
    %c0_10 = arith.constant 0 : index
    %c0_11 = arith.constant 0 : index
    %22 = vector.load %arg1[%c0_9, %c2, %c0_10, %c0_11] : memref<4x4x2x64xf32, #tpu.memory_space<vmem>>, vector<1x1x2x64xf32>
    %23 = vector.shape_cast %22 : vector<1x1x2x64xf32> to vector<2x64xf32>
    %24 = vector.broadcast %21 : f32 to vector<2x64xf32>
    %25 = arith.mulf %24, %23 : vector<2x64xf32>
    %26 = arith.addf %17, %25 : vector<2x64xf32>
    %c4_i32_12 = arith.constant 4 : i32
    %27 = arith.muli %1, %c4_i32_12 : i32
    %c3_i32 = arith.constant 3 : i32
    %28 = arith.addi %27, %c3_i32 : i32
    %29 = arith.index_cast %28 : i32 to index
    %30 = memref.load %arg2[%29] : memref<16xf32, #tpu.memory_space<smem>>
    %c0_13 = arith.constant 0 : index
    %c3 = arith.constant 3 : index
    %c0_14 = arith.constant 0 : index
    %c0_15 = arith.constant 0 : index
    %31 = vector.load %arg1[%c0_13, %c3, %c0_14, %c0_15] : memref<4x4x2x64xf32, #tpu.memory_space<vmem>>, vector<1x1x2x64xf32>
    %32 = vector.shape_cast %31 : vector<1x1x2x64xf32> to vector<2x64xf32>
    %33 = vector.broadcast %30 : f32 to vector<2x64xf32>
    %34 = arith.mulf %33, %32 : vector<2x64xf32>
    %35 = arith.addf %26, %34 : vector<2x64xf32>
    %36 = vector.shape_cast %35 : vector<2x64xf32> to vector<1x2x64xf32>
    %cst = arith.constant dense<0.000000e+00> : vector<1xf32>
    %37 = vector.multi_reduction <add>, %36, %cst [1, 2] : vector<1x2x64xf32> to vector<1xf32>
    %38 = vector.shape_cast %37 : vector<1xf32> to vector<1x1x1xf32>
    %39 = vector.extract %38[0, 0, 0] : f32 from vector<1x1x1xf32>
    %cst_16 = arith.constant 7.812500e-03 : f32
    %40 = arith.mulf %39, %cst_16 : f32
    %41 = arith.mulf %35, %35 : vector<2x64xf32>
    %42 = vector.shape_cast %41 : vector<2x64xf32> to vector<1x2x64xf32>
    %cst_17 = arith.constant dense<0.000000e+00> : vector<1xf32>
    %43 = vector.multi_reduction <add>, %42, %cst_17 [1, 2] : vector<1x2x64xf32> to vector<1xf32>
    %44 = vector.shape_cast %43 : vector<1xf32> to vector<1x1x1xf32>
    %45 = vector.extract %44[0, 0, 0] : f32 from vector<1x1x1xf32>
    %cst_18 = arith.constant 7.812500e-03 : f32
    %46 = arith.mulf %45, %cst_18 : f32
    %47 = arith.mulf %40, %40 : f32
    %48 = arith.subf %46, %47 : f32
    %cst_19 = arith.constant 9.99999974E-6 : f32
    %49 = arith.addf %48, %cst_19 : f32
    %50 = math.rsqrt %49 : f32
    %51 = arith.index_cast %1 : i32 to index
    %52 = memref.load %arg3[%51] : memref<4xf32, #tpu.memory_space<smem>>
    %53 = arith.mulf %50, %52 : f32
    %54 = arith.index_cast %1 : i32 to index
    %55 = memref.load %arg4[%54] : memref<4xf32, #tpu.memory_space<smem>>
    %56 = arith.mulf %40, %53 : f32
    %57 = arith.subf %55, %56 : f32
    %58 = vector.broadcast %53 : f32 to vector<2x64xf32>
    %59 = arith.mulf %35, %58 : vector<2x64xf32>
    %60 = vector.broadcast %57 : f32 to vector<2x64xf32>
    %61 = arith.addf %59, %60 : vector<2x64xf32>
    %cst_20 = arith.constant 0.000000e+00 : f32
    %cst_21 = arith.constant 6.000000e+00 : f32
    %62 = vector.broadcast %cst_20 : f32 to vector<2x64xf32>
    %63 = arith.maximumf %62, %61 : vector<2x64xf32>
    %64 = vector.broadcast %cst_21 : f32 to vector<2x64xf32>
    %65 = arith.minimumf %64, %63 : vector<2x64xf32>
    %c0_22 = arith.constant 0 : index
    %c0_23 = arith.constant 0 : index
    %c0_24 = arith.constant 0 : index
    %66 = vector.load %arg5[%c0_22, %c0_23, %c0_24] : memref<2x4x64xf32, #tpu.memory_space<vmem>>, vector<2x1x64xf32>
    %67 = vector.shape_cast %66 : vector<2x1x64xf32> to vector<2x64xf32>
    %68 = vector.shape_cast %65 : vector<2x64xf32> to vector<2x1x64xf32>
    tpu.vector_store %arg5[%c0_22, %c0_23, %c0_24], %68 {strides = array<i32>} : memref<2x4x64xf32, #tpu.memory_space<vmem>>, vector<2x1x64xf32>,
    %c4_i32_25 = arith.constant 4 : i32
    %69 = arith.muli %arg0, %c4_i32_25 : i32
    %c1_i32_26 = arith.constant 1 : i32
    %70 = arith.addi %69, %c1_i32_26 : i32
    %c4_i32_27 = arith.constant 4 : i32
    %71 = arith.muli %70, %c4_i32_27 : i32
    %72 = arith.index_cast %71 : i32 to index
    %73 = memref.load %arg2[%72] : memref<16xf32, #tpu.memory_space<smem>>
    %c1_28 = arith.constant 1 : index
    %c0_29 = arith.constant 0 : index
    %c0_30 = arith.constant 0 : index
    %c0_31 = arith.constant 0 : index
    %74 = vector.load %arg1[%c1_28, %c0_29, %c0_30, %c0_31] : memref<4x4x2x64xf32, #tpu.memory_space<vmem>>, vector<1x1x2x64xf32>
    %75 = vector.shape_cast %74 : vector<1x1x2x64xf32> to vector<2x64xf32>
    %76 = vector.broadcast %73 : f32 to vector<2x64xf32>
    %77 = arith.mulf %76, %75 : vector<2x64xf32>
    %c4_i32_32 = arith.constant 4 : i32
    %78 = arith.muli %70, %c4_i32_32 : i32
    %c1_i32_33 = arith.constant 1 : i32
    %79 = arith.addi %78, %c1_i32_33 : i32
    %80 = arith.index_cast %79 : i32 to index
    %81 = memref.load %arg2[%80] : memref<16xf32, #tpu.memory_space<smem>>
    %c1_34 = arith.constant 1 : index
    %c1_35 = arith.constant 1 : index
    %c0_36 = arith.constant 0 : index
    %c0_37 = arith.constant 0 : index
    %82 = vector.load %arg1[%c1_34, %c1_35, %c0_36, %c0_37] : memref<4x4x2x64xf32, #tpu.memory_space<vmem>>, vector<1x1x2x64xf32>
    %83 = vector.shape_cast %82 : vector<1x1x2x64xf32> to vector<2x64xf32>
    %84 = vector.broadcast %81 : f32 to vector<2x64xf32>
    %85 = arith.mulf %84, %83 : vector<2x64xf32>
    %86 = arith.addf %77, %85 : vector<2x64xf32>
    %c4_i32_38 = arith.constant 4 : i32
    %87 = arith.muli %70, %c4_i32_38 : i32
    %c2_i32_39 = arith.constant 2 : i32
    %88 = arith.addi %87, %c2_i32_39 : i32
    %89 = arith.index_cast %88 : i32 to index
    %90 = memref.load %arg2[%89] : memref<16xf32, #tpu.memory_space<smem>>
    %c1_40 = arith.constant 1 : index
    %c2_41 = arith.constant 2 : index
    %c0_42 = arith.constant 0 : index
    %c0_43 = arith.constant 0 : index
    %91 = vector.load %arg1[%c1_40, %c2_41, %c0_42, %c0_43] : memref<4x4x2x64xf32, #tpu.memory_space<vmem>>, vector<1x1x2x64xf32>
    %92 = vector.shape_cast %91 : vector<1x1x2x64xf32> to vector<2x64xf32>
    %93 = vector.broadcast %90 : f32 to vector<2x64xf32>
    %94 = arith.mulf %93, %92 : vector<2x64xf32>
    %95 = arith.addf %86, %94 : vector<2x64xf32>
    %c4_i32_44 = arith.constant 4 : i32
    %96 = arith.muli %70, %c4_i32_44 : i32
    %c3_i32_45 = arith.constant 3 : i32
    %97 = arith.addi %96, %c3_i32_45 : i32
    %98 = arith.index_cast %97 : i32 to index
    %99 = memref.load %arg2[%98] : memref<16xf32, #tpu.memory_space<smem>>
    %c1_46 = arith.constant 1 : index
    %c3_47 = arith.constant 3 : index
    %c0_48 = arith.constant 0 : index
    %c0_49 = arith.constant 0 : index
    %100 = vector.load %arg1[%c1_46, %c3_47, %c0_48, %c0_49] : memref<4x4x2x64xf32, #tpu.memory_space<vmem>>, vector<1x1x2x64xf32>
    %101 = vector.shape_cast %100 : vector<1x1x2x64xf32> to vector<2x64xf32>
    %102 = vector.broadcast %99 : f32 to vector<2x64xf32>
    %103 = arith.mulf %102, %101 : vector<2x64xf32>
    %104 = arith.addf %95, %103 : vector<2x64xf32>
    %105 = vector.shape_cast %104 : vector<2x64xf32> to vector<1x2x64xf32>
    %cst_50 = arith.constant dense<0.000000e+00> : vector<1xf32>
    %106 = vector.multi_reduction <add>, %105, %cst_50 [1, 2] : vector<1x2x64xf32> to vector<1xf32>
    %107 = vector.shape_cast %106 : vector<1xf32> to vector<1x1x1xf32>
    %108 = vector.extract %107[0, 0, 0] : f32 from vector<1x1x1xf32>
    %cst_51 = arith.constant 7.812500e-03 : f32
    %109 = arith.mulf %108, %cst_51 : f32
    %110 = arith.mulf %104, %104 : vector<2x64xf32>
    %111 = vector.shape_cast %110 : vector<2x64xf32> to vector<1x2x64xf32>
    %cst_52 = arith.constant dense<0.000000e+00> : vector<1xf32>
    %112 = vector.multi_reduction <add>, %111, %cst_52 [1, 2] : vector<1x2x64xf32> to vector<1xf32>
    %113 = vector.shape_cast %112 : vector<1xf32> to vector<1x1x1xf32>
    %114 = vector.extract %113[0, 0, 0] : f32 from vector<1x1x1xf32>
    %cst_53 = arith.constant 7.812500e-03 : f32
    %115 = arith.mulf %114, %cst_53 : f32
    %116 = arith.mulf %109, %109 : f32
    %117 = arith.subf %115, %116 : f32
    %cst_54 = arith.constant 9.99999974E-6 : f32
    %118 = arith.addf %117, %cst_54 : f32
    %119 = math.rsqrt %118 : f32
    %120 = arith.index_cast %70 : i32 to index
    %121 = memref.load %arg3[%120] : memref<4xf32, #tpu.memory_space<smem>>
    %122 = arith.mulf %119, %121 : f32
    %123 = arith.index_cast %70 : i32 to index
    %124 = memref.load %arg4[%123] : memref<4xf32, #tpu.memory_space<smem>>
    %125 = arith.mulf %109, %122 : f32
    %126 = arith.subf %124, %125 : f32
    %127 = vector.broadcast %122 : f32 to vector<2x64xf32>
    %128 = arith.mulf %104, %127 : vector<2x64xf32>
    %129 = vector.broadcast %126 : f32 to vector<2x64xf32>
    %130 = arith.addf %128, %129 : vector<2x64xf32>
    %cst_55 = arith.constant 0.000000e+00 : f32
    %cst_56 = arith.constant 6.000000e+00 : f32
    %131 = vector.broadcast %cst_55 : f32 to vector<2x64xf32>
    %132 = arith.maximumf %131, %130 : vector<2x64xf32>
    %133 = vector.broadcast %cst_56 : f32 to vector<2x64xf32>
    %134 = arith.minimumf %133, %132 : vector<2x64xf32>
    %c0_57 = arith.constant 0 : index
    %c1_58 = arith.constant 1 : index
    %c0_59 = arith.constant 0 : index
    %135 = vector.load %arg5[%c0_57, %c1_58, %c0_59] : memref<2x4x64xf32, #tpu.memory_space<vmem>>, vector<2x1x64xf32>
    %136 = vector.shape_cast %135 : vector<2x1x64xf32> to vector<2x64xf32>
    %137 = vector.shape_cast %134 : vector<2x64xf32> to vector<2x1x64xf32>
    tpu.vector_store %arg5[%c0_57, %c1_58, %c0_59], %137 {strides = array<i32>} : memref<2x4x64xf32, #tpu.memory_space<vmem>>, vector<2x1x64xf32>,
    %c4_i32_60 = arith.constant 4 : i32
    %138 = arith.muli %arg0, %c4_i32_60 : i32
    %c2_i32_61 = arith.constant 2 : i32
    %139 = arith.addi %138, %c2_i32_61 : i32
    %c4_i32_62 = arith.constant 4 : i32
    %140 = arith.muli %139, %c4_i32_62 : i32
    %141 = arith.index_cast %140 : i32 to index
    %142 = memref.load %arg2[%141] : memref<16xf32, #tpu.memory_space<smem>>
    %c2_63 = arith.constant 2 : index
    %c0_64 = arith.constant 0 : index
    %c0_65 = arith.constant 0 : index
    %c0_66 = arith.constant 0 : index
    %143 = vector.load %arg1[%c2_63, %c0_64, %c0_65, %c0_66] : memref<4x4x2x64xf32, #tpu.memory_space<vmem>>, vector<1x1x2x64xf32>
    %144 = vector.shape_cast %143 : vector<1x1x2x64xf32> to vector<2x64xf32>
    %145 = vector.broadcast %142 : f32 to vector<2x64xf32>
    %146 = arith.mulf %145, %144 : vector<2x64xf32>
    %c4_i32_67 = arith.constant 4 : i32
    %147 = arith.muli %139, %c4_i32_67 : i32
    %c1_i32_68 = arith.constant 1 : i32
    %148 = arith.addi %147, %c1_i32_68 : i32
    %149 = arith.index_cast %148 : i32 to index
    %150 = memref.load %arg2[%149] : memref<16xf32, #tpu.memory_space<smem>>
    %c2_69 = arith.constant 2 : index
    %c1_70 = arith.constant 1 : index
    %c0_71 = arith.constant 0 : index
    %c0_72 = arith.constant 0 : index
    %151 = vector.load %arg1[%c2_69, %c1_70, %c0_71, %c0_72] : memref<4x4x2x64xf32, #tpu.memory_space<vmem>>, vector<1x1x2x64xf32>
    %152 = vector.shape_cast %151 : vector<1x1x2x64xf32> to vector<2x64xf32>
    %153 = vector.broadcast %150 : f32 to vector<2x64xf32>
    %154 = arith.mulf %153, %152 : vector<2x64xf32>
    %155 = arith.addf %146, %154 : vector<2x64xf32>
    %c4_i32_73 = arith.constant 4 : i32
    %156 = arith.muli %139, %c4_i32_73 : i32
    %c2_i32_74 = arith.constant 2 : i32
    %157 = arith.addi %156, %c2_i32_74 : i32
    %158 = arith.index_cast %157 : i32 to index
    %159 = memref.load %arg2[%158] : memref<16xf32, #tpu.memory_space<smem>>
    %c2_75 = arith.constant 2 : index
    %c2_76 = arith.constant 2 : index
    %c0_77 = arith.constant 0 : index
    %c0_78 = arith.constant 0 : index
    %160 = vector.load %arg1[%c2_75, %c2_76, %c0_77, %c0_78] : memref<4x4x2x64xf32, #tpu.memory_space<vmem>>, vector<1x1x2x64xf32>
    %161 = vector.shape_cast %160 : vector<1x1x2x64xf32> to vector<2x64xf32>
    %162 = vector.broadcast %159 : f32 to vector<2x64xf32>
    %163 = arith.mulf %162, %161 : vector<2x64xf32>
    %164 = arith.addf %155, %163 : vector<2x64xf32>
    %c4_i32_79 = arith.constant 4 : i32
    %165 = arith.muli %139, %c4_i32_79 : i32
    %c3_i32_80 = arith.constant 3 : i32
    %166 = arith.addi %165, %c3_i32_80 : i32
    %167 = arith.index_cast %166 : i32 to index
    %168 = memref.load %arg2[%167] : memref<16xf32, #tpu.memory_space<smem>>
    %c2_81 = arith.constant 2 : index
    %c3_82 = arith.constant 3 : index
    %c0_83 = arith.constant 0 : index
    %c0_84 = arith.constant 0 : index
    %169 = vector.load %arg1[%c2_81, %c3_82, %c0_83, %c0_84] : memref<4x4x2x64xf32, #tpu.memory_space<vmem>>, vector<1x1x2x64xf32>
    %170 = vector.shape_cast %169 : vector<1x1x2x64xf32> to vector<2x64xf32>
    %171 = vector.broadcast %168 : f32 to vector<2x64xf32>
    %172 = arith.mulf %171, %170 : vector<2x64xf32>
    %173 = arith.addf %164, %172 : vector<2x64xf32>
    %174 = vector.shape_cast %173 : vector<2x64xf32> to vector<1x2x64xf32>
    %cst_85 = arith.constant dense<0.000000e+00> : vector<1xf32>
    %175 = vector.multi_reduction <add>, %174, %cst_85 [1, 2] : vector<1x2x64xf32> to vector<1xf32>
    %176 = vector.shape_cast %175 : vector<1xf32> to vector<1x1x1xf32>
    %177 = vector.extract %176[0, 0, 0] : f32 from vector<1x1x1xf32>
    %cst_86 = arith.constant 7.812500e-03 : f32
    %178 = arith.mulf %177, %cst_86 : f32
    %179 = arith.mulf %173, %173 : vector<2x64xf32>
    %180 = vector.shape_cast %179 : vector<2x64xf32> to vector<1x2x64xf32>
    %cst_87 = arith.constant dense<0.000000e+00> : vector<1xf32>
    %181 = vector.multi_reduction <add>, %180, %cst_87 [1, 2] : vector<1x2x64xf32> to vector<1xf32>
    %182 = vector.shape_cast %181 : vector<1xf32> to vector<1x1x1xf32>
    %183 = vector.extract %182[0, 0, 0] : f32 from vector<1x1x1xf32>
    %cst_88 = arith.constant 7.812500e-03 : f32
    %184 = arith.mulf %183, %cst_88 : f32
    %185 = arith.mulf %178, %178 : f32
    %186 = arith.subf %184, %185 : f32
    %cst_89 = arith.constant 9.99999974E-6 : f32
    %187 = arith.addf %186, %cst_89 : f32
    %188 = math.rsqrt %187 : f32
    %189 = arith.index_cast %139 : i32 to index
    %190 = memref.load %arg3[%189] : memref<4xf32, #tpu.memory_space<smem>>
    %191 = arith.mulf %188, %190 : f32
    %192 = arith.index_cast %139 : i32 to index
    %193 = memref.load %arg4[%192] : memref<4xf32, #tpu.memory_space<smem>>
    %194 = arith.mulf %178, %191 : f32
    %195 = arith.subf %193, %194 : f32
    %196 = vector.broadcast %191 : f32 to vector<2x64xf32>
    %197 = arith.mulf %173, %196 : vector<2x64xf32>
    %198 = vector.broadcast %195 : f32 to vector<2x64xf32>
    %199 = arith.addf %197, %198 : vector<2x64xf32>
    %cst_90 = arith.constant 0.000000e+00 : f32
    %cst_91 = arith.constant 6.000000e+00 : f32
    %200 = vector.broadcast %cst_90 : f32 to vector<2x64xf32>
    %201 = arith.maximumf %200, %199 : vector<2x64xf32>
    %202 = vector.broadcast %cst_91 : f32 to vector<2x64xf32>
    %203 = arith.minimumf %202, %201 : vector<2x64xf32>
    %c0_92 = arith.constant 0 : index
    %c2_93 = arith.constant 2 : index
    %c0_94 = arith.constant 0 : index
    %204 = vector.load %arg5[%c0_92, %c2_93, %c0_94] : memref<2x4x64xf32, #tpu.memory_space<vmem>>, vector<2x1x64xf32>
    %205 = vector.shape_cast %204 : vector<2x1x64xf32> to vector<2x64xf32>
    %206 = vector.shape_cast %203 : vector<2x64xf32> to vector<2x1x64xf32>
    tpu.vector_store %arg5[%c0_92, %c2_93, %c0_94], %206 {strides = array<i32>} : memref<2x4x64xf32, #tpu.memory_space<vmem>>, vector<2x1x64xf32>,
    %c4_i32_95 = arith.constant 4 : i32
    %207 = arith.muli %arg0, %c4_i32_95 : i32
    %c3_i32_96 = arith.constant 3 : i32
    %208 = arith.addi %207, %c3_i32_96 : i32
    %c4_i32_97 = arith.constant 4 : i32
    %209 = arith.muli %208, %c4_i32_97 : i32
    %210 = arith.index_cast %209 : i32 to index
    %211 = memref.load %arg2[%210] : memref<16xf32, #tpu.memory_space<smem>>
    %c3_98 = arith.constant 3 : index
    %c0_99 = arith.constant 0 : index
    %c0_100 = arith.constant 0 : index
    %c0_101 = arith.constant 0 : index
    %212 = vector.load %arg1[%c3_98, %c0_99, %c0_100, %c0_101] : memref<4x4x2x64xf32, #tpu.memory_space<vmem>>, vector<1x1x2x64xf32>
    %213 = vector.shape_cast %212 : vector<1x1x2x64xf32> to vector<2x64xf32>
    %214 = vector.broadcast %211 : f32 to vector<2x64xf32>
    %215 = arith.mulf %214, %213 : vector<2x64xf32>
    %c4_i32_102 = arith.constant 4 : i32
    %216 = arith.muli %208, %c4_i32_102 : i32
    %c1_i32_103 = arith.constant 1 : i32
    %217 = arith.addi %216, %c1_i32_103 : i32
    %218 = arith.index_cast %217 : i32 to index
    %219 = memref.load %arg2[%218] : memref<16xf32, #tpu.memory_space<smem>>
    %c3_104 = arith.constant 3 : index
    %c1_105 = arith.constant 1 : index
    %c0_106 = arith.constant 0 : index
    %c0_107 = arith.constant 0 : index
    %220 = vector.load %arg1[%c3_104, %c1_105, %c0_106, %c0_107] : memref<4x4x2x64xf32, #tpu.memory_space<vmem>>, vector<1x1x2x64xf32>
    %221 = vector.shape_cast %220 : vector<1x1x2x64xf32> to vector<2x64xf32>
    %222 = vector.broadcast %219 : f32 to vector<2x64xf32>
    %223 = arith.mulf %222, %221 : vector<2x64xf32>
    %224 = arith.addf %215, %223 : vector<2x64xf32>
    %c4_i32_108 = arith.constant 4 : i32
    %225 = arith.muli %208, %c4_i32_108 : i32
    %c2_i32_109 = arith.constant 2 : i32
    %226 = arith.addi %225, %c2_i32_109 : i32
    %227 = arith.index_cast %226 : i32 to index
    %228 = memref.load %arg2[%227] : memref<16xf32, #tpu.memory_space<smem>>
    %c3_110 = arith.constant 3 : index
    %c2_111 = arith.constant 2 : index
    %c0_112 = arith.constant 0 : index
    %c0_113 = arith.constant 0 : index
    %229 = vector.load %arg1[%c3_110, %c2_111, %c0_112, %c0_113] : memref<4x4x2x64xf32, #tpu.memory_space<vmem>>, vector<1x1x2x64xf32>
    %230 = vector.shape_cast %229 : vector<1x1x2x64xf32> to vector<2x64xf32>
    %231 = vector.broadcast %228 : f32 to vector<2x64xf32>
    %232 = arith.mulf %231, %230 : vector<2x64xf32>
    %233 = arith.addf %224, %232 : vector<2x64xf32>
    %c4_i32_114 = arith.constant 4 : i32
    %234 = arith.muli %208, %c4_i32_114 : i32
    %c3_i32_115 = arith.constant 3 : i32
    %235 = arith.addi %234, %c3_i32_115 : i32
    %236 = arith.index_cast %235 : i32 to index
    %237 = memref.load %arg2[%236] : memref<16xf32, #tpu.memory_space<smem>>
    %c3_116 = arith.constant 3 : index
    %c3_117 = arith.constant 3 : index
    %c0_118 = arith.constant 0 : index
    %c0_119 = arith.constant 0 : index
    %238 = vector.load %arg1[%c3_116, %c3_117, %c0_118, %c0_119] : memref<4x4x2x64xf32, #tpu.memory_space<vmem>>, vector<1x1x2x64xf32>
    %239 = vector.shape_cast %238 : vector<1x1x2x64xf32> to vector<2x64xf32>
    %240 = vector.broadcast %237 : f32 to vector<2x64xf32>
    %241 = arith.mulf %240, %239 : vector<2x64xf32>
    %242 = arith.addf %233, %241 : vector<2x64xf32>
    %243 = vector.shape_cast %242 : vector<2x64xf32> to vector<1x2x64xf32>
    %cst_120 = arith.constant dense<0.000000e+00> : vector<1xf32>
    %244 = vector.multi_reduction <add>, %243, %cst_120 [1, 2] : vector<1x2x64xf32> to vector<1xf32>
    %245 = vector.shape_cast %244 : vector<1xf32> to vector<1x1x1xf32>
    %246 = vector.extract %245[0, 0, 0] : f32 from vector<1x1x1xf32>
    %cst_121 = arith.constant 7.812500e-03 : f32
    %247 = arith.mulf %246, %cst_121 : f32
    %248 = arith.mulf %242, %242 : vector<2x64xf32>
    %249 = vector.shape_cast %248 : vector<2x64xf32> to vector<1x2x64xf32>
    %cst_122 = arith.constant dense<0.000000e+00> : vector<1xf32>
    %250 = vector.multi_reduction <add>, %249, %cst_122 [1, 2] : vector<1x2x64xf32> to vector<1xf32>
    %251 = vector.shape_cast %250 : vector<1xf32> to vector<1x1x1xf32>
    %252 = vector.extract %251[0, 0, 0] : f32 from vector<1x1x1xf32>
    %cst_123 = arith.constant 7.812500e-03 : f32
    %253 = arith.mulf %252, %cst_123 : f32
    %254 = arith.mulf %247, %247 : f32
    %255 = arith.subf %253, %254 : f32
    %cst_124 = arith.constant 9.99999974E-6 : f32
    %256 = arith.addf %255, %cst_124 : f32
    %257 = math.rsqrt %256 : f32
    %258 = arith.index_cast %208 : i32 to index
    %259 = memref.load %arg3[%258] : memref<4xf32, #tpu.memory_space<smem>>
    %260 = arith.mulf %257, %259 : f32
    %261 = arith.index_cast %208 : i32 to index
    %262 = memref.load %arg4[%261] : memref<4xf32, #tpu.memory_space<smem>>
    %263 = arith.mulf %247, %260 : f32
    %264 = arith.subf %262, %263 : f32
    %265 = vector.broadcast %260 : f32 to vector<2x64xf32>
    %266 = arith.mulf %242, %265 : vector<2x64xf32>
    %267 = vector.broadcast %264 : f32 to vector<2x64xf32>
    %268 = arith.addf %266, %267 : vector<2x64xf32>
    %cst_125 = arith.constant 0.000000e+00 : f32
    %cst_126 = arith.constant 6.000000e+00 : f32
    %269 = vector.broadcast %cst_125 : f32 to vector<2x64xf32>
    %270 = arith.maximumf %269, %268 : vector<2x64xf32>
    %271 = vector.broadcast %cst_126 : f32 to vector<2x64xf32>
    %272 = arith.minimumf %271, %270 : vector<2x64xf32>
    %c0_127 = arith.constant 0 : index
    %c3_128 = arith.constant 3 : index
    %c0_129 = arith.constant 0 : index
    %273 = vector.load %arg5[%c0_127, %c3_128, %c0_129] : memref<2x4x64xf32, #tpu.memory_space<vmem>>, vector<2x1x64xf32>
    %274 = vector.shape_cast %273 : vector<2x1x64xf32> to vector<2x64xf32>
    %275 = vector.shape_cast %272 : vector<2x64xf32> to vector<2x1x64xf32>
    tpu.vector_store %arg5[%c0_127, %c3_128, %c0_129], %275 {strides = array<i32>} : memref<2x4x64xf32, #tpu.memory_space<vmem>>, vector<2x1x64xf32>,
    return
  }
  func.func @transform_0(%arg0: i32) -> (i32, i32, i32, i32) {
    %c0_i32 = arith.constant 0 : i32
    %c0_i32_0 = arith.constant 0 : i32
    %c0_i32_1 = arith.constant 0 : i32
    %c0_i32_2 = arith.constant 0 : i32
    return %arg0, %c0_i32, %c0_i32_0, %c0_i32_1 : i32, i32, i32, i32
  }
  func.func @transform_1(%arg0: i32) -> i32 {
    %c0_i32 = arith.constant 0 : i32
    %c0_i32_0 = arith.constant 0 : i32
    return %c0_i32 : i32
  }
  func.func @transform_2(%arg0: i32) -> i32 {
    %c0_i32 = arith.constant 0 : i32
    %c0_i32_0 = arith.constant 0 : i32
    return %c0_i32 : i32
  }
  func.func @transform_3(%arg0: i32) -> i32 {
    %c0_i32 = arith.constant 0 : i32
    %c0_i32_0 = arith.constant 0 : i32
    return %c0_i32 : i32
  }
  func.func @transform_4(%arg0: i32) -> (i32, i32, i32) {
    %c0_i32 = arith.constant 0 : i32
    %c0_i32_0 = arith.constant 0 : i32
    %c0_i32_1 = arith.constant 0 : i32
    return %c0_i32, %arg0, %c0_i32_0 : i32, i32, i32
  }
}

</mosaic_0001>

<bundles_post_ra>
// kernel: tpu_custom_call.1
= control target key start
LH: loop header
LB: loop body
LE: loop exit
PB: predicated region body
PF: predicated region fallthrough
CT: control target
= control target key end

     0   :  { %9 = vsyncpa [#allocation3], 0  ;;  %s687_s0 = inlined_call_operand.hbm [shape: f32[4,4,2,64], index: 0, kind: input, shape index: {}]   ;;  %s688_s1 = inlined_call_operand.hbm [shape: f32[16], index: 1, kind: input, shape index: {}]   ;;  %s689_s2 = inlined_call_operand.vmem [shape: f32[4], index: 2, kind: input, shape index: {}]   ;;  %s690_s3 = inlined_call_operand.vmem [shape: f32[4], index: 3, kind: input, shape index: {}]   ;;  %s691_s4 = inlined_call_operand.hbm [shape: f32[2,4,64], index: 4, kind: output, shape index: {}]  }
   0x1   :  { %10 = vsyncpa [#allocation5], 0 }
   0x2   :  { %11 = vsyncpa [#allocation6], 0 }
   0x3   :  { %12 = vsyncpa [#allocation10], 0 }
   0x4   :  { %13 = vsyncpa [#allocation4], 0  ;;  %s18_s17 = sshll.u32 %s687_s0, 4  ;;  %s578_s18 = smov [#allocation2]   ;;  %s19_s17 = int_to_ptr.hbm [resolvable:$true] %s18_s17 }
   0x5   :  { %s20_s19 = sshll.u32 %s578_s18, 4  ;;  %s32_s22 = sshll.u32 %s688_s1, 4  ;;  %s21_s19 = int_to_ptr.vmem [resolvable:$true] %s20_s19  ;;  %s33_s22 = int_to_ptr.hbm [resolvable:$true] %s32_s22 }
   0x6   :  { %s579_s23 = smov 32   ;;  %s580_s24 = smov 2  }
   0x7   :  { %26 = dma.hbm_to_vmem [thread:$0]  %s19_s17, 512, %s21_s19, [#allocation3], %s579_s23, %s579_s23, %s580_s24  }
   0x8   :  { %s581_s25 = smov [#allocation7]   ;;  %s41_s28 = sshll.u32 %s689_s2, 4  ;;  %s42_s28 = int_to_ptr.vmem [resolvable:$true] %s41_s28 }
   0x9   :  { %35 = dma.hbm_to_smem %s33_s22, 16, %s581_s25, [#allocation5]  }
   0xa   :  { %s50_s30 = sshll.u32 %s690_s3, 4  ;;  %s582_s5 = smov [#allocation8]   ;;  %s51_s30 = int_to_ptr.vmem [resolvable:$true] %s50_s30 }
   0xb   :  { %44 = dma.vmem_to_smem %s42_s28, 16, %s582_s5, [#allocation6]  }
   0xc   :  { %s583_s6 = smov [#allocation9]  }
   0xd   :  { %53 = dma.vmem_to_smem %s51_s30, 16, %s583_s6, [#allocation10]  }
   0xe   :  { %568 = dma.done.wait [#allocation3], 512  }
   0xf   :  { %569 = vsyncadd [#allocation3], 4294966784 }
  0x10   :  { %570 = dma.done.wait [#allocation5], 16  }
  0x11   :  { %571 = vsyncadd [#allocation5], 4294967280 }
  0x12   :  { %572 = dma.done.wait [#allocation6], 16  }
  0x13   :  { %573 = vsyncadd [#allocation6], 4294967280 }
  0x14   :  { %574 = dma.done.wait [#allocation10], 16  }
  0x15   :  { %575 = vsyncadd [#allocation10], 4294967280 }
  0x16   :  { %70 = sfence }
  0x17   :  { %s73_s1 = sld [smem:[#allocation7]]  ;;  %v74_v0 = vld [vmem:[#allocation2] sm:$0x3]  ;;  %v80_v1 = vld [vmem:[#allocation2 + $0x2] sm:$0x3]  ;;  %vm98_vm0 = vcmask 517120  }
  0x18   :  { %s422_s2 = sld [smem:[#allocation7 + $0x1]]  ;;  %v87_v3 = vld [vmem:[#allocation2 + $0x4] sm:$0x3]  ;;  %v94_v6 = vld [vmem:[#allocation2 + $0x6] sm:$0x3]  ;;  %vm151_vm4 = vcmask 516096  }
  0x19   :  { %s423_s7 = sld [smem:[#allocation7 + $0x2]]  ;;  %v158_v9 = vld [vmem:[#allocation2 + $0x8] sm:$0x3]  ;;  %v164_v12 = vld [vmem:[#allocation2 + $0xa] sm:$0x3] }
  0x1a   :  { %s424_s8 = sld [smem:[#allocation7 + $0x3]]  ;;  %v171_v16 = vld [vmem:[#allocation2 + $0xc] sm:$0x3]  ;;  %v178_v19 = vld [vmem:[#allocation2 + $0xe] sm:$0x3] }
  0x1b   :  { %s425_s3 = sld [smem:[#allocation7 + $0x4]]  ;;  %v240_v36 = vld [vmem:[#allocation2 + $0x10] sm:$0x3]  ;;  %v246_v38 = vld [vmem:[#allocation2 + $0x12] sm:$0x3] }
  0x1c   :  { %s426_s9 = sld [smem:[#allocation7 + $0x5]]  ;;  %v253_v40 = vld [vmem:[#allocation2 + $0x14] sm:$0x3]  ;;  %v260_v46 = vld [vmem:[#allocation2 + $0x16] sm:$0x3] }
  0x1d   :  { %v75_v2 = vstv %s73_s1  ;;  %s427_s10 = sld [smem:[#allocation7 + $0x6]] }
  0x1e   :  { %v76_v4 = vmul.f32 %v75_v2, %v74_v0  ;;  %v81_v5 = vstv %s422_s2  ;;  %s428_s11 = sld [smem:[#allocation7 + $0x7]] }
  0x1f   :  { %v82_v7 = vmul.f32 %v81_v5, %v80_v1  ;;  %v88_v8 = vstv %s423_s7  ;;  %s431_s12 = sld [smem:[#allocation7 + $0x8]]  ;;  %v322_v5 = vld [vmem:[#allocation2 + $0x18] sm:$0x3] }
  0x20   :  { %v89_v10 = vmul.f32 %v88_v8, %v87_v3  ;;  %v95_v11 = vstv %s424_s8  ;;  %s432_s13 = sld [smem:[#allocation7 + $0x9]] }
  0x21   :  { %v83_v13 = vadd.f32 %v82_v7, %v76_v4  ;;  %v96_v14 = vmul.f32 %v95_v11, %v94_v6  ;;  %v159_v15 = vstv %s425_s3  ;;  %s433_s14 = sld [smem:[#allocation7 + $0xa]]  ;;  %v328_v7 = vld [vmem:[#allocation2 + $0x1a] sm:$0x3] }
  0x22   :  { %v160_v17 = vmul.f32 %v159_v15, %v158_v9  ;;  %v165_v18 = vstv %s426_s9  ;;  %s434_s15 = sld [smem:[#allocation7 + $0xb]]  ;;  %v335_v9 = vld [vmem:[#allocation2 + $0x1c] sm:$0x3]  ;;  %v342_v15 = vld [vmem:[#allocation2 + $0x1e] sm:$0x3] }
  0x23   :  { %v90_v20 = vadd.f32 %v89_v10, %v83_v13  ;;  %v166_v21 = vmul.f32 %v165_v18, %v164_v12  ;;  %v172_v22 = vstv %s427_s10  ;;  %s437_s16 = sld [smem:[#allocation7 + $0xc]] }
  0x24   :  { %v173_v23 = vmul.f32 %v172_v22, %v171_v16  ;;  %v179_v24 = vstv %s428_s11  ;;  %s438_s17 = sld [smem:[#allocation7 + $0xd]] }
  0x25   :  { %v624_v25 = vadd.f32 %v96_v14, %v90_v20  ;;  %v167_v26 = vadd.f32 %v166_v21, %v160_v17  ;;  %v180_v27 = vmul.f32 %v179_v24, %v178_v19  ;;  %v241_v37 = vstv %s431_s12  ;;  %s439_s18 = sld [smem:[#allocation7 + $0xe]] }
  0x26   :  { %v247_v39 = vstv %s432_s13  ;;  %v242_v43 = vmul.f32 %v241_v37, %v240_v36  ;;  %s440_s19 = sld [smem:[#allocation7 + $0xf]] }
  0x27   :  { %v99_v28 = vsel %vm98_vm0, %v624_v25, 0.0  ;;  %v174_v29 = vadd.f32 %v173_v23, %v167_v26  ;;  %v110_v30 = vmul.f32 %v624_v25, %v624_v25  ;;  %v254_v41 = vstv %s433_s14  ;;  %s137_s27 = sld [smem:[#allocation8]] }
  0x28   :  { %100 = vadd.xlane.f32.xlu0 %v99_v28  ;;  %v261_v42 = vstv %s434_s15  ;;  %v248_v44 = vmul.f32 %v247_v39, %v246_v38  ;;  %v255_v45 = vmul.f32 %v254_v41, %v253_v40  ;;  %s139_s28 = sld [smem:[#allocation9]] }
  0x29   :  { %v630_v31 = vadd.f32 %v180_v27, %v174_v29  ;;  %v111_v33 = vsel %vm98_vm0, %v110_v30, 0.0  ;;  %v262_v48 = vmul.f32 %v261_v42, %v260_v46  ;;  %v323_v6 = vstv %s437_s16  ;;  %s429_s10 = sld [smem:[#allocation8 + $0x1]] }
  0x2a   :  { %v249_v47 = vadd.f32 %v248_v44, %v242_v43  ;;  %v329_v8 = vstv %s438_s17  ;;  %v324_v12 = vmul.f32 %v323_v6, %v322_v5  ;;  %s430_s11 = sld [smem:[#allocation9 + $0x1]] }
  0x2b   :  { %v182_v32 = vsel %vm98_vm0, %v630_v31, 0.0  ;;  %v193_v34 = vmul.f32 %v630_v31, %v630_v31  ;;  %v336_v10 = vstv %s439_s18  ;;  %v330_v13 = vmul.f32 %v329_v8, %v328_v7 }
  0x2c   :  { %183 = vadd.xlane.f32.xlu1 %v182_v32  ;;  %v256_v49 = vadd.f32 %v255_v45, %v249_v47  ;;  %v343_v11 = vstv %s440_s19  ;;  %v337_v14 = vmul.f32 %v336_v10, %v335_v9 }
  0x2d   :  { %v194_v35 = vsel %vm98_vm0, %v193_v34, 0.0  ;;  %v331_v16 = vadd.f32 %v330_v13, %v324_v12  ;;  %v344_v17 = vmul.f32 %v343_v11, %v342_v15 }
  0x2e   :  { %v638_v50 = vadd.f32 %v262_v48, %v256_v49 }
  0x2f   :  { %v338_v18 = vadd.f32 %v337_v14, %v331_v16 }
  0x30   :  { %112 = vadd.xlane.f32.xlu0 %v111_v33  ;;  %v264_v51 = vsel %vm98_vm0, %v638_v50, 0.0  ;;  %v275_v53 = vmul.f32 %v638_v50, %v638_v50 }
  0x31   :  { %265 = vadd.xlane.f32.xlu2 %v264_v51  ;;  %v649_v20 = vadd.f32 %v344_v17, %v338_v18 }
  0x32   :  { %v276_v56 = vsel %vm98_vm0, %v275_v53, 0.0 }
  0x33   :  { %v346_v22 = vsel %vm98_vm0, %v649_v20, 0.0  ;;  %v357_v23 = vmul.f32 %v649_v20, %v649_v20 }
  0x34   :  { %195 = vadd.xlane.f32.xlu1 %v194_v35 }
  0x35   :  { %v358_v27 = vsel %vm98_vm0, %v357_v23, 0.0 }
  0x38   :  { %347 = vadd.xlane.f32.xlu0 %v346_v22 }
  0x39   :  { %277 = vadd.xlane.f32.xlu2 %v276_v56 }
  0x3c   :  { %359 = vadd.xlane.f32.xlu1 %v358_v27 }
  0x9b   :  { %v101_v52 = vpop.xlane.xlu0 %100 }
  0x9c   :  { %v102_v54 = vrot.slane %v101_v52, 4 }
  0x9e   :  { %v103_v55 = vadd.f32 %v102_v54, %v101_v52 }
  0x9f   :  { %v184_v4 = vpop.xlane.xlu1 %183 }
  0xa0   :  { %v104_v57 = vrot.slane %v103_v55, 2  ;;  %v185_v21 = vrot.slane %v184_v4, 4 }
  0xa2   :  { %v105_v58 = vadd.f32 %v104_v57, %v103_v55  ;;  %v186_v28 = vadd.f32 %v185_v21, %v184_v4 }
  0xa3   :  { %v113_v59 = vpop.xlane.xlu0 %112 }
  0xa4   :  { %v114_v60 = vrot.slane %v113_v59, 4  ;;  %v106_v61 = vrot.slane %v105_v58, 1  ;;  %v187_v30 = vrot.slane %v186_v28, 2  ;;  %v266_v46 = vpop.xlane.xlu2 %265 }
  0xa5   :  { %v267_v53 = vrot.slane %v266_v46, 4 }
  0xa6   :  { %v115_v62 = vadd.f32 %v114_v60, %v113_v59  ;;  %v107_v63 = vadd.f32 %v106_v61, %v105_v58  ;;  %v188_v36 = vadd.f32 %v187_v30, %v186_v28 }
  0xa7   :  { %v196_v19 = vpop.xlane.xlu1 %195  ;;  %v268_v58 = vadd.f32 %v267_v53, %v266_v46 }
  0xa8   :  { %v116_v0 = vrot.slane %v115_v62, 2  ;;  %443 = vpush %v107_v63  ;;  %v197_v24 = vrot.slane %v196_v19, 4  ;;  %v189_v40 = vrot.slane %v188_v36, 1 }
  0xaa   :  { %v117_v1 = vadd.f32 %v116_v0, %v115_v62  ;;  %v198_v29 = vadd.f32 %v197_v24, %v196_v19  ;;  %v190_v44 = vadd.f32 %v189_v40, %v188_v36 }
  0xab   :  { %v348_v13 = vpop.xlane.xlu0 %347 }
  0xac   :  { %v118_v2 = vrot.slane %v117_v1, 1  ;;  %v199_v33 = vrot.slane %v198_v29, 2  ;;  %v278_v51 = vpop.xlane.xlu2 %277  ;;  %v349_v17 = vrot.slane %v348_v13, 4 }
  0xad   :  { %v279_v55 = vrot.slane %v278_v51, 4 }
  0xae   :  { %v119_v3 = vadd.f32 %v118_v2, %v117_v1  ;;  %v200_v37 = vadd.f32 %v199_v33, %v198_v29  ;;  %v350_v23 = vadd.f32 %v349_v17, %v348_v13 }
  0xaf   :  { %v280_v60 = vadd.f32 %v279_v55, %v278_v51  ;;  %v360_v15 = vpop.xlane.xlu1 %359 }
  0xb0   :  { %445 = vpush %v119_v3  ;;  %v201_v41 = vrot.slane %v200_v37, 1  ;;  %v361_v19 = vrot.slane %v360_v15, 4 }
  0xb1   :  { %v281_v62 = vrot.slane %v280_v60, 2 }
  0xb2   :  { %v202_v45 = vadd.f32 %v201_v41, %v200_v37 }
  0xb3   :  { %v282_v2 = vadd.f32 %v281_v62, %v280_v60 }
  0xb5   :  { %v283_v6 = vrot.slane %v282_v2, 1 }
  0xb7   :  { %v284_v10 = vadd.f32 %v283_v6, %v282_v2 }
  0xd9   :  { %s444_s20 = spop %443 }
  0xda   :  { %s645_s21 = smul.f32 0.0078125, %s444_s20 }
  0xdc   :  { %s122_s22 = smul.f32 %s645_s21, %s645_s21 }
  0xe1   :  { %s446_s23 = spop %445 }
  0xe2   :  { %s121_s24 = smul.f32 0.0078125, %s446_s23  ;;  %s435_s23 = sld [smem:[#allocation8 + $0x2]] }
  0xe4   :  { %s123_s25 = ssub.f32 %s121_s24, %s122_s22 }
  0xe5   :  { %s436_s24 = sld [smem:[#allocation9 + $0x2]] }
  0xe6   :  { %s124_s26 = sadd.f32 1e-05, %s123_s25 }
  0xe8   :  { %v125_v26 = vstv %s124_s26 }
  0xe9   :  { %476 = vrsqrt.f32 %v125_v26  ;;  %vm132_vm2 = vweird.f32 %v125_v26 }
  0xef   :  { %v477_v32 = vpop.eup %476 }
  0xf0   :  { %v127_v34 = vmul.f32 %v477_v32, %v125_v26  ;;  %vm133_vm1 = vweird.f32 %v477_v32  ;;  %v362_v26 = vadd.f32 %v361_v19, %v360_v15 }
  0xf1   :  { %vm134_vm3 = vmor %vm132_vm2, %vm133_vm1 }
  0xf2   :  { %v128_v35 = vmul.f32 %v477_v32, %v127_v34  ;;  %v363_v28 = vrot.slane %v362_v26, 2 }
  0xf4   :  { %v129_v38 = vmul.f32 0.5, %v128_v35  ;;  %v364_v33 = vadd.f32 %v363_v28, %v362_v26 }
  0xf6   :  { %v130_v39 = vsub.f32 1.5, %v129_v38  ;;  %v365_v37 = vrot.slane %v364_v33, 1 }
  0xf8   :  { %v131_v42 = vmul.f32 %v477_v32, %v130_v39  ;;  %v366_v41 = vadd.f32 %v365_v37, %v364_v33 }
  0xfa   :  { %v135_v43 = vsel %vm134_vm3, %v477_v32, %v131_v42 }
  0xfb   :  { %447 = vpush %v135_v43 }
  0xfc   :  { %449 = vpush %v190_v44 }
  0xfd   :  { %451 = vpush %v202_v45 }
 0x12c   :  { %s448_s0 = spop %447 }
 0x12d   :  { %s138_s29 = smul.f32 %s448_s0, %s137_s27  ;;  %s450_s30 = spop %449 }
 0x12e   :  { %s656_s5 = smul.f32 0.0078125, %s450_s30  ;;  %s452_s6 = spop %451 }
 0x12f   :  { %s140_s1 = smul.f32 %s138_s29, %s645_s21  ;;  %v142_v47 = vstv %s138_s29 }
 0x130   :  { %s205_s2 = smul.f32 %s656_s5, %s656_s5  ;;  %v143_v48 = vmul.f32 %v142_v47, %v624_v25  ;;  %v269_v25 = vrot.slane %v268_v58, 2 }
 0x131   :  { %s141_s7 = ssub.f32 %s139_s28, %s140_s1  ;;  %s204_s8 = smul.f32 0.0078125, %s452_s6 }
 0x132   :  { %v270_v1 = vadd.f32 %v269_v25, %v268_v58 }
 0x133   :  { %v144_v49 = vstv %s141_s7  ;;  %s206_s3 = ssub.f32 %s204_s8, %s205_s2 }
 0x134   :  { %v145_v52 = vadd.f32 %v144_v49, %v143_v48  ;;  %v271_v5 = vrot.slane %v270_v1, 1  ;;  %s441_s7 = sld [smem:[#allocation8 + $0x3]] }
 0x135   :  { %s207_s9 = sadd.f32 1e-05, %s206_s3 }
 0x136   :  { %v146_v54 = vmax.f32 %v145_v52, 0.0  ;;  %v272_v9 = vadd.f32 %v271_v5, %v270_v1  ;;  %s442_s8 = sld [smem:[#allocation9 + $0x3]] }
 0x137   :  { %v208_v56 = vstv %s207_s9 }
 0x138   :  { %v147_v57 = vmin.f32 %v146_v54, 6.0  ;;  %478 = vrsqrt.f32 %v208_v56  ;;  %vm215_vm6 = vweird.f32 %v208_v56 }
 0x13a   :  { %v149_v59 = vrot.slane %v147_v57, 1  ;;  %152 = vst.msk [vmem:[#allocation11] sm:$0x1] %vm151_vm4, %v147_v57 }
 0x13c   :  { %153 = vst.msk [vmem:[#allocation11 + $0x4] sm:$0x1] %vm151_vm4, %v149_v59 }
 0x13e   :  { %v479_v61 = vpop.eup %478 }
 0x13f   :  { %v210_v63 = vmul.f32 %v479_v61, %v208_v56  ;;  %vm216_vm5 = vweird.f32 %v479_v61 }
 0x140   :  { %vm217_vm7 = vmor %vm215_vm6, %vm216_vm5 }
 0x141   :  { %v211_v0 = vmul.f32 %v479_v61, %v210_v63 }
 0x143   :  { %v212_v3 = vmul.f32 0.5, %v211_v0 }
 0x145   :  { %v213_v4 = vsub.f32 1.5, %v212_v3 }
 0x147   :  { %v214_v7 = vmul.f32 %v479_v61, %v213_v4 }
 0x149   :  { %v218_v8 = vsel %vm217_vm7, %v479_v61, %v214_v7 }
 0x14a   :  { %453 = vpush %v218_v8 }
 0x14b   :  { %455 = vpush %v272_v9 }
 0x14c   :  { %457 = vpush %v284_v10 }
 0x17b   :  { %s454_s12 = spop %453 }
 0x17c   :  { %s221_s13 = smul.f32 %s454_s12, %s429_s10  ;;  %s456_s14 = spop %455 }
 0x17d   :  { %s664_s15 = smul.f32 0.0078125, %s456_s14  ;;  %s458_s16 = spop %457 }
 0x17e   :  { %s223_s17 = smul.f32 %s221_s13, %s656_s5  ;;  %v225_v11 = vstv %s221_s13  ;;  %s584_s12 = smov [#allocation11]  }
 0x17f   :  { %s287_s18 = smul.f32 %s664_s15, %s664_s15  ;;  %v226_v12 = vmul.f32 %v225_v11, %v630_v31  ;;  %v351_v31 = vrot.slane %v350_v23, 2  ;;  %s404_s13 = sshll.u32 %s584_s12, 4  ;;  %s405_s13 = int_to_ptr.vmem [resolvable:$true] %s404_s13 }
 0x180   :  { %s224_s19 = ssub.f32 %s430_s11, %s223_s17  ;;  %s286_s20 = smul.f32 0.0078125, %s458_s16 }
 0x181   :  { %v352_v32 = vadd.f32 %v351_v31, %v350_v23  ;;  %s406_s16 = sshll.u32 %s691_s4, 4  ;;  %s585_s17 = smov 64   ;;  %s407_s16 = int_to_ptr.hbm [resolvable:$true] %s406_s16 }
 0x182   :  { %v227_v14 = vstv %s224_s19  ;;  %s288_s21 = ssub.f32 %s286_s20, %s287_s18  ;;  %s586_s18 = smov 4  }
 0x183   :  { %v228_v16 = vadd.f32 %v227_v14, %v226_v12  ;;  %v353_v36 = vrot.slane %v352_v32, 1 }
 0x184   :  { %s289_s22 = sadd.f32 1e-05, %s288_s21 }
 0x185   :  { %v229_v18 = vmax.f32 %v228_v16, 0.0  ;;  %v354_v40 = vadd.f32 %v353_v36, %v352_v32 }
 0x186   :  { %v290_v21 = vstv %s289_s22 }
 0x187   :  { %v230_v22 = vmin.f32 %v229_v18, 6.0  ;;  %480 = vrsqrt.f32 %v290_v21  ;;  %vm297_vm9 = vweird.f32 %v290_v21 }
 0x189   :  { %v232_v24 = vrot.slane %v230_v22, 1  ;;  %234 = vst.msk [vmem:[#allocation11 + $0x1] sm:$0x1] %vm151_vm4, %v230_v22 }
 0x18b   :  { %235 = vst.msk [vmem:[#allocation11 + $0x5] sm:$0x1] %vm151_vm4, %v232_v24 }
 0x18d   :  { %v481_v27 = vpop.eup %480 }
 0x18e   :  { %v292_v29 = vmul.f32 %v481_v27, %v290_v21  ;;  %vm298_vm8 = vweird.f32 %v481_v27 }
 0x18f   :  { %vm299_vm10 = vmor %vm297_vm9, %vm298_vm8 }
 0x190   :  { %v293_v30 = vmul.f32 %v481_v27, %v292_v29 }
 0x192   :  { %v294_v34 = vmul.f32 0.5, %v293_v30 }
 0x194   :  { %v295_v35 = vsub.f32 1.5, %v294_v34 }
 0x196   :  { %v296_v38 = vmul.f32 %v481_v27, %v295_v35 }
 0x198   :  { %v300_v39 = vsel %vm299_vm10, %v481_v27, %v296_v38 }
 0x199   :  { %459 = vpush %v300_v39 }
 0x19a   :  { %461 = vpush %v354_v40 }
 0x19b   :  { %463 = vpush %v366_v41 }
 0x1ca   :  { %s460_s25 = spop %459 }
 0x1cb   :  { %s303_s26 = smul.f32 %s460_s25, %s435_s23  ;;  %s462_s27 = spop %461 }
 0x1cc   :  { %s672_s28 = smul.f32 0.0078125, %s462_s27  ;;  %s464_s0 = spop %463 }
 0x1cd   :  { %s305_s29 = smul.f32 %s303_s26, %s664_s15  ;;  %v307_v42 = vstv %s303_s26 }
 0x1ce   :  { %s369_s30 = smul.f32 %s672_s28, %s672_s28  ;;  %v308_v43 = vmul.f32 %v307_v42, %v638_v50 }
 0x1cf   :  { %s306_s5 = ssub.f32 %s436_s24, %s305_s29  ;;  %s368_s6 = smul.f32 0.0078125, %s464_s0 }
 0x1d1   :  { %v309_v44 = vstv %s306_s5  ;;  %s370_s1 = ssub.f32 %s368_s6, %s369_s30 }
 0x1d2   :  { %v310_v45 = vadd.f32 %v309_v44, %v308_v43 }
 0x1d3   :  { %s371_s2 = sadd.f32 1e-05, %s370_s1 }
 0x1d4   :  { %v311_v46 = vmax.f32 %v310_v45, 0.0 }
 0x1d5   :  { %v372_v47 = vstv %s371_s2 }
 0x1d6   :  { %v312_v48 = vmin.f32 %v311_v46, 6.0  ;;  %482 = vrsqrt.f32 %v372_v47  ;;  %vm379_vm12 = vweird.f32 %v372_v47 }
 0x1d8   :  { %v314_v49 = vrot.slane %v312_v48, 1  ;;  %316 = vst.msk [vmem:[#allocation11 + $0x2] sm:$0x1] %vm151_vm4, %v312_v48 }
 0x1da   :  { %317 = vst.msk [vmem:[#allocation11 + $0x6] sm:$0x1] %vm151_vm4, %v314_v49 }
 0x1dc   :  { %v483_v51 = vpop.eup %482 }
 0x1dd   :  { %v374_v52 = vmul.f32 %v483_v51, %v372_v47  ;;  %vm380_vm11 = vweird.f32 %v483_v51 }
 0x1de   :  { %vm381_vm13 = vmor %vm379_vm12, %vm380_vm11 }
 0x1df   :  { %v375_v53 = vmul.f32 %v483_v51, %v374_v52 }
 0x1e1   :  { %v376_v54 = vmul.f32 0.5, %v375_v53 }
 0x1e3   :  { %v377_v55 = vsub.f32 1.5, %v376_v54 }
 0x1e5   :  { %v378_v50 = vmul.f32 %v483_v51, %v377_v55 }
 0x1e7   :  { %v382_v56 = vsel %vm381_vm13, %v483_v51, %v378_v50 }
 0x1e8   :  { %465 = vpush %v382_v56 }
 0x219   :  { %s466_s3 = spop %465 }
 0x21a   :  { %s385_s9 = smul.f32 %s466_s3, %s441_s7 }
 0x21c   :  { %s387_s10 = smul.f32 %s385_s9, %s672_s28  ;;  %v389_v57 = vstv %s385_s9 }
 0x21d   :  { %v390_v58 = vmul.f32 %v389_v57, %v649_v20 }
 0x21e   :  { %s388_s11 = ssub.f32 %s442_s8, %s387_s10 }
 0x220   :  { %v391_v59 = vstv %s388_s11 }
 0x221   :  { %v392_v60 = vadd.f32 %v391_v59, %v390_v58 }
 0x223   :  { %v393_v25 = vmax.f32 %v392_v60, 0.0 }
 0x225   :  { %v394_v61 = vmin.f32 %v393_v25, 6.0 }
 0x227   :  { %v396_v62 = vrot.slane %v394_v61, 1  ;;  %398 = vst.msk [vmem:[#allocation11 + $0x3] sm:$0x1] %vm151_vm4, %v394_v61 }
 0x229   :  { %399 = vst.msk [vmem:[#allocation11 + $0x7] sm:$0x1] %vm151_vm4, %v396_v62 }
 0x22a   :  { %412 = dma.vmem_to_hbm [thread:$0]  %s405_s13, 128, %s407_s16, [#allocation4], %s585_s17, %s585_s17, %s586_s18  }
 0x22b   :  { %576 = dma.done.wait [#allocation4], 128  }
 0x22c   :  { %577 = vsyncadd [#allocation4], 4294967168 }
 0x22d   :  { %417 = vsyncpa [#allocation3], 1 }
 0x22e   :  { %418 = vsyncpa [#allocation4], 1 }
 0x22f   :  { %419 = vsyncpa [#allocation5], 1 }
 0x230   :  { %420 = vsyncpa [#allocation6], 1 }
 0x231   :  { %421 = vsyncpa [#allocation10], 1 }

</bundles_post_ra>
